<compile_context>
chip_gen: v6e
topology: v6e:2x2x1
jax: 0.10.0
libtpu: 0.0.40
codegen_flags: <defaults>
</compile_context>

<pallas_src>
import functools

import jax
import jax.numpy as jnp
from jax.experimental import pallas as pl
from jax.experimental.pallas import tpu as pltpu

# ---------------- small synthetic BERT config ----------------
VOCAB = 100
HIDDEN = 32            # stands in for 768 of the real BertModel
N_HEADS = 4
HEAD_DIM = HIDDEN // N_HEADS
N_LAYERS = 2
INTERMEDIATE = 64
MAX_POS = 16
OUT_DIM = 16           # EntityEmbeddingBert `dim`
LN_EPS = 1e-12


def _pick_tile_m(M):
    """Largest multiple-of-8 row tile that divides M and leaves >=2 grid steps."""
    for cand in (256, 128, 64, 32, 16, 8):
        if cand < M and M % cand == 0:
            return cand
    return M


# ---------------- Pallas kernels ----------------
def _ln_kernel(x_ref, g_ref, b_ref, o_ref, *, eps):
    """Plain LayerNorm over the last dim (f32 stats, cast at store)."""
    x = x_ref[...].astype(jnp.float32)
    mu = jnp.mean(x, axis=-1, keepdims=True)
    var = jnp.mean(jnp.square(x - mu), axis=-1, keepdims=True)
    y = (x - mu) * jax.lax.rsqrt(var + eps)
    o_ref[...] = (y * g_ref[...] + b_ref[...]).astype(o_ref.dtype)


def pallas_layernorm(x, gamma, beta, eps=LN_EPS, out_dtype=jnp.bfloat16):
    M, H = x.shape
    tm = _pick_tile_m(M)
    return pl.pallas_call(
        functools.partial(_ln_kernel, eps=eps),
        out_shape=jax.ShapeDtypeStruct((M, H), out_dtype),
        grid=(M // tm,),
        in_specs=[
            pl.BlockSpec((tm, H), lambda i: (i, 0)),
            pl.BlockSpec((1, H), lambda i: (0, 0)),
            pl.BlockSpec((1, H), lambda i: (0, 0)),
        ],
        out_specs=pl.BlockSpec((tm, H), lambda i: (i, 0)),
        compiler_params=pltpu.CompilerParams(dimension_semantics=("parallel",)),
    )(x, gamma, beta)


def _attn_block_kernel(x_ref, mask_ref, wqkv_ref, bqkv_ref, wo_ref, bo_ref,
                       g_ref, b_ref, o_ref, *, n_heads, head_dim, eps):
    """Fused self-attention block for one batch element (all heads in one grid step).

    QKV proj -> scaled-dot-product attention -> output proj -> residual -> LayerNorm.
    Weights are head-major: wqkv [nH, H, 3*Dh], wo [nH, Dh, H], so no activation
    reshapes/transposes are needed in the kernel.
    """
    x_bf = x_ref[0]                                    # (S, H) bf16
    S, H = x_bf.shape
    scale = 1.0 / (head_dim ** 0.5)

    # Fused per-head QKV projection: one batched MXU matmul with N = 3*head_dim.
    xb = jnp.broadcast_to(x_bf[None], (n_heads, S, H))                   # (nH,S,H) bf16
    qkv = jnp.einsum('nsh,nhe->nse', xb, wqkv_ref[...],
                     preferred_element_type=jnp.float32) + bqkv_ref[...]  # (nH,S,3Dh) f32
    q = qkv[:, :, 0:head_dim].astype(jnp.bfloat16)
    k = qkv[:, :, head_dim:2 * head_dim].astype(jnp.bfloat16)
    v = qkv[:, :, 2 * head_dim:3 * head_dim].astype(jnp.bfloat16)

    # Scores + softmax in f32; additive mask is (1, 1, S) and broadcasts over heads/rows.
    s = jnp.einsum('nqd,nkd->nqk', q, k, preferred_element_type=jnp.float32)
    s = s * scale + mask_ref[...]
    s = s - jnp.max(s, axis=-1, keepdims=True)
    p = jnp.exp(s)
    p = p * pl.reciprocal(jnp.sum(p, axis=-1, keepdims=True), approx=True)

    ctx = jnp.einsum('nqk,nkd->nqd', p.astype(jnp.bfloat16), v,
                     preferred_element_type=jnp.float32)                  # (nH,S,Dh) f32
    out_h = jnp.einsum('nqd,ndh->nqh', ctx.astype(jnp.bfloat16), wo_ref[...],
                       preferred_element_type=jnp.float32)                # (nH,S,H)  f32
    attn = jnp.sum(out_h, axis=0) + bo_ref[...]                           # (S,H)

    # Residual + LayerNorm epilogue (f32 stats, single cast at store).
    h = attn + x_bf.astype(jnp.float32)
    mu = jnp.mean(h, axis=-1, keepdims=True)
    var = jnp.mean(jnp.square(h - mu), axis=-1, keepdims=True)
    y = (h - mu) * jax.lax.rsqrt(var + eps)
    o_ref[0] = (y * g_ref[...] + b_ref[...]).astype(o_ref.dtype)


def pallas_attention_block(x_bsh, mask_add, wqkv_h, bqkv_h, wo_h, bo, g, b,
                           *, n_heads, head_dim, eps=LN_EPS):
    B, S, H = x_bsh.shape
    kern = functools.partial(_attn_block_kernel, n_heads=n_heads,
                             head_dim=head_dim, eps=eps)
    return pl.pallas_call(
        kern,
        out_shape=jax.ShapeDtypeStruct((B, S, H), jnp.bfloat16),
        grid=(B,),
        in_specs=[
            pl.BlockSpec((1, S, H), lambda i: (i, 0, 0)),
            pl.BlockSpec((1, 1, S), lambda i: (i, 0, 0)),      # mask stays [B,1,S]
            pl.BlockSpec(wqkv_h.shape, lambda i: (0, 0, 0)),
            pl.BlockSpec(bqkv_h.shape, lambda i: (0, 0, 0)),
            pl.BlockSpec(wo_h.shape, lambda i: (0, 0, 0)),
            pl.BlockSpec(bo.shape, lambda i: (0, 0)),
            pl.BlockSpec(g.shape, lambda i: (0, 0)),
            pl.BlockSpec(b.shape, lambda i: (0, 0)),
        ],
        out_specs=pl.BlockSpec((1, S, H), lambda i: (i, 0, 0)),
        compiler_params=pltpu.CompilerParams(dimension_semantics=("parallel",)),
    )(x_bsh, mask_add, wqkv_h, bqkv_h, wo_h, bo, g, b)


def _ffn_block_kernel(x_ref, wi_ref, bi_ref, wo_ref, bo_ref, g_ref, b_ref, o_ref, *, eps):
    """Fused FFN block: GELU(x@Wi+bi)@Wo2+bo2 -> residual -> LayerNorm."""
    x_bf = x_ref[...]                                                     # (TM,H) bf16
    h1 = jnp.dot(x_bf, wi_ref[...], preferred_element_type=jnp.float32) + bi_ref[...]
    # TODO(synk): HF BertModel default hidden_act='gelu' is the exact erf GELU; the
    # tanh approximation is used here (negligible numeric difference).
    h1 = 0.5 * h1 * (1.0 + jnp.tanh(0.7978845608028654 * (h1 + 0.044715 * h1 * h1 * h1)))
    h2 = jnp.dot(h1.astype(jnp.bfloat16), wo_ref[...],
                 preferred_element_type=jnp.float32) + bo_ref[...]
    h = h2 + x_bf.astype(jnp.float32)
    mu = jnp.mean(h, axis=-1, keepdims=True)
    var = jnp.mean(jnp.square(h - mu), axis=-1, keepdims=True)
    y = (h - mu) * jax.lax.rsqrt(var + eps)
    o_ref[...] = (y * g_ref[...] + b_ref[...]).astype(o_ref.dtype)


def pallas_ffn_block(x, wi, bi, wo2, bo2, g, b, eps=LN_EPS):
    M, H = x.shape
    inter = wi.shape[1]
    tm = _pick_tile_m(M)
    return pl.pallas_call(
        functools.partial(_ffn_block_kernel, eps=eps),
        out_shape=jax.ShapeDtypeStruct((M, H), jnp.bfloat16),
        grid=(M // tm,),
        in_specs=[
            pl.BlockSpec((tm, H), lambda i: (i, 0)),
            pl.BlockSpec((H, inter), lambda i: (0, 0)),
            pl.BlockSpec((1, inter), lambda i: (0, 0)),
            pl.BlockSpec((inter, H), lambda i: (0, 0)),
            pl.BlockSpec((1, H), lambda i: (0, 0)),
            pl.BlockSpec((1, H), lambda i: (0, 0)),
            pl.BlockSpec((1, H), lambda i: (0, 0)),
        ],
        out_specs=pl.BlockSpec((tm, H), lambda i: (i, 0)),
        compiler_params=pltpu.CompilerParams(dimension_semantics=("parallel",)),
    )(x, wi, bi, wo2, bo2, g, b)


def _linear_kernel(x_ref, w_ref, b_ref, o_ref):
    y = jnp.dot(x_ref[...], w_ref[...], preferred_element_type=jnp.float32) + b_ref[...]
    o_ref[...] = y.astype(o_ref.dtype)


def pallas_linear(x, w, b, out_dtype=jnp.float32):
    """y = x @ w + b.  x: [M, K] bf16, w: [K, N] bf16, b: [1, N] f32."""
    M, K = x.shape
    _, N = w.shape
    tm = _pick_tile_m(M)
    return pl.pallas_call(
        _linear_kernel,
        out_shape=jax.ShapeDtypeStruct((M, N), out_dtype),
        grid=(M // tm,),
        in_specs=[
            pl.BlockSpec((tm, K), lambda i: (i, 0)),
            pl.BlockSpec((K, N), lambda i: (0, 0)),
            pl.BlockSpec((1, N), lambda i: (0, 0)),
        ],
        out_specs=pl.BlockSpec((tm, N), lambda i: (i, 0)),
        compiler_params=pltpu.CompilerParams(dimension_semantics=("parallel",)),
    )(x, w, b)


# ---------------- deterministic parameter init ----------------
def init_params(key):
    def w(k, shape, dtype=jnp.bfloat16):
        return (jax.random.normal(k, shape, jnp.float32) * 0.02).astype(dtype)

    keys = jax.random.split(key, 4 + N_LAYERS)
    params = {
        "word_emb": w(keys[0], (VOCAB, HIDDEN), jnp.float32),
        "pos_emb": w(keys[1], (MAX_POS, HIDDEN), jnp.float32),
        "type_emb": w(keys[2], (2, HIDDEN), jnp.float32),
        "emb_ln_g": jnp.ones((1, HIDDEN), jnp.float32),
        "emb_ln_b": jnp.zeros((1, HIDDEN), jnp.float32),
        "layers": [],
    }
    for l in range(N_LAYERS):
        lk = jax.random.split(keys[3 + l], 4)
        params["layers"].append(dict(
            # head-major fused QKV weight [nH, H, 3*Dh] and output proj [nH, Dh, H]
            wqkv_h=w(lk[0], (N_HEADS, HIDDEN, 3 * HEAD_DIM)),
            bqkv_h=jnp.zeros((N_HEADS, 1, 3 * HEAD_DIM), jnp.float32),
            wo_h=w(lk[1], (N_HEADS, HEAD_DIM, HIDDEN)),
            bo=jnp.zeros((1, HIDDEN), jnp.float32),
            ln1_g=jnp.ones((1, HIDDEN), jnp.float32),
            ln1_b=jnp.zeros((1, HIDDEN), jnp.float32),
            wi=w(lk[2], (HIDDEN, INTERMEDIATE)),
            bi=jnp.zeros((1, INTERMEDIATE), jnp.float32),
            wo2=w(lk[3], (INTERMEDIATE, HIDDEN)),
            bo2=jnp.zeros((1, HIDDEN), jnp.float32),
            ln2_g=jnp.ones((1, HIDDEN), jnp.float32),
            ln2_b=jnp.zeros((1, HIDDEN), jnp.float32),
        ))
    params["w_mean"] = w(keys[3 + N_LAYERS], (HIDDEN, OUT_DIM))   # the `mean_layer`
    params["b_mean"] = jnp.zeros((1, OUT_DIM), jnp.float32)
    return params


# ---------------- forward (glue in JAX, hot path in fused Pallas kernels) ----------------
@jax.jit
def entity_embedding_bert_forward(params, input_ids, attention_masks):
    # TODO(synk): head_mask kwarg transpose path not implemented (no head_mask supplied).
    B, S = input_ids.shape
    H = HIDDEN

    # --- BERT embeddings (table lookups are XLA glue; LayerNorm in Pallas, no zero residual) ---
    we = params["word_emb"][input_ids]                    # [B, S, H] f32
    pe = params["pos_emb"][:S][None, :, :]
    te = params["type_emb"][0][None, None, :]             # token_type_ids defaults to 0
    emb = (we + pe + te).reshape(B * S, H)
    x = pallas_layernorm(emb, params["emb_ln_g"], params["emb_ln_b"])     # bf16 [B*S, H]

    # additive attention mask, kept at [B, 1, S] in f32 (indexed per batch inside the kernel)
    mask_add = (1.0 - attention_masks.astype(jnp.float32))[:, None, :] * -1e9

    # --- BERT encoder layers: 2 fused Pallas kernels per layer ---
    for layer in params["layers"]:
        x = pallas_attention_block(
            x.reshape(B, S, H), mask_add,
            layer["wqkv_h"], layer["bqkv_h"], layer["wo_h"], layer["bo"],
            layer["ln1_g"], layer["ln1_b"],
            n_heads=N_HEADS, head_dim=HEAD_DIM).reshape(B * S, H)
        x = pallas_ffn_block(x, layer["wi"], layer["bi"],
                             layer["wo2"], layer["bo2"],
                             layer["ln2_g"], layer["ln2_b"])

    # --- last_hidden_state[:, 0] -> mean_layer (dropout in the module is never applied) ---
    cls = x.reshape(B, S, H)[:, 0]                                        # [B, H] bf16
    embedded = pallas_linear(cls, params["w_mean"], params["b_mean"])     # [B, OUT_DIM] f32
    return (embedded,)


if __name__ == "__main__":
    key = jax.random.PRNGKey(0)
    pkey, dkey = jax.random.split(key)
    params = init_params(pkey)

    B, S = 2, 8
    input_ids = jax.random.randint(dkey, (B, S), 0, VOCAB, dtype=jnp.int32)
    attention_masks = jnp.ones((B, S), jnp.int32)

    (out,) = entity_embedding_bert_forward(params, input_ids, attention_masks)
    jax.block_until_ready(out)
    assert out.shape == (B, OUT_DIM) and out.dtype == jnp.float32
    assert bool(jnp.all(jnp.isfinite(out)))
    print("KERNEL_OK")
</pallas_src>

<mosaic_0001>
module attributes {stable_mosaic.version = 11 : i64} {
  func.func @_ffn_block_kernel(%arg0: i32, %arg1: memref<8x32xbf16, #tpu.memory_space<vmem>>, %arg2: memref<32x64xbf16, #tpu.memory_space<vmem>>, %arg3: memref<1x64xf32, #tpu.memory_space<vmem>>, %arg4: memref<64x32xbf16, #tpu.memory_space<vmem>>, %arg5: memref<1x32xf32, #tpu.memory_space<vmem>>, %arg6: memref<1x32xf32, #tpu.memory_space<vmem>>, %arg7: memref<1x32xf32, #tpu.memory_space<vmem>>, %arg8: memref<8x32xbf16, #tpu.memory_space<vmem>>) attributes {dimension_semantics = [#tpu.dimension_semantics<parallel>], iteration_bounds = array<i64: 2>, scalar_prefetch = 0 : i64, scratch_operands = 0 : i64, tpu.core_type = #tpu.core_type<tc>, window_params = [{transform_indices = @transform_0, window_bounds = array<i64: 8, 32>}, {pipeline_mode = #tpu.pipeline_mode<synchronous>, transform_indices = @transform_1, window_bounds = array<i64: 32, 64>}, {pipeline_mode = #tpu.pipeline_mode<synchronous>, transform_indices = @transform_2, window_bounds = array<i64: 1, 64>}, {pipeline_mode = #tpu.pipeline_mode<synchronous>, transform_indices = @transform_3, window_bounds = array<i64: 64, 32>}, {pipeline_mode = #tpu.pipeline_mode<synchronous>, transform_indices = @transform_4, window_bounds = array<i64: 1, 32>}, {pipeline_mode = #tpu.pipeline_mode<synchronous>, transform_indices = @transform_5, window_bounds = array<i64: 1, 32>}, {pipeline_mode = #tpu.pipeline_mode<synchronous>, transform_indices = @transform_6, window_bounds = array<i64: 1, 32>}, {transform_indices = @transform_7, window_bounds = array<i64: 8, 32>}]} {
    %c0 = arith.constant 0 : index
    %c0_0 = arith.constant 0 : index
    %0 = vector.load %arg1[%c0, %c0_0] : memref<8x32xbf16, #tpu.memory_space<vmem>>, vector<8x32xbf16>
    %c0_1 = arith.constant 0 : index
    %c0_2 = arith.constant 0 : index
    %1 = vector.load %arg2[%c0_1, %c0_2] : memref<32x64xbf16, #tpu.memory_space<vmem>>, vector<32x64xbf16>
    %cst = arith.constant dense<0.000000e+00> : vector<8x64xf32>
    %2 = tpu.matmul %0, %1, %cst {dimension_numbers = #tpu.dot_dimension_numbers<[1], [0], [0], [1], [0, 0, 1, 1], [], []>} : vector<8x32xbf16>, vector<32x64xbf16>, vector<8x64xf32> -> vector<8x64xf32>
    %c0_3 = arith.constant 0 : index
    %c0_4 = arith.constant 0 : index
    %3 = vector.load %arg3[%c0_3, %c0_4] : memref<1x64xf32, #tpu.memory_space<vmem>>, vector<1x64xf32>
    %4 = vector.broadcast %3 : vector<1x64xf32> to vector<8x64xf32>
    %5 = arith.addf %2, %4 : vector<8x64xf32>
    %cst_5 = arith.constant 5.000000e-01 : f32
    %6 = vector.broadcast %cst_5 : f32 to vector<8x64xf32>
    %7 = arith.mulf %6, %5 : vector<8x64xf32>
    %cst_6 = arith.constant 4.471500e-02 : f32
    %8 = vector.broadcast %cst_6 : f32 to vector<8x64xf32>
    %9 = arith.mulf %8, %5 : vector<8x64xf32>
    %10 = arith.mulf %9, %5 : vector<8x64xf32>
    %11 = arith.mulf %10, %5 : vector<8x64xf32>
    %12 = arith.addf %5, %11 : vector<8x64xf32>
    %cst_7 = arith.constant 0.797884583 : f32
    %13 = vector.broadcast %cst_7 : f32 to vector<8x64xf32>
    %14 = arith.mulf %13, %12 : vector<8x64xf32>
    %15 = math.tanh %14 : vector<8x64xf32>
    %cst_8 = arith.constant 1.000000e+00 : f32
    %16 = vector.broadcast %cst_8 : f32 to vector<8x64xf32>
    %17 = arith.addf %16, %15 : vector<8x64xf32>
    %18 = arith.mulf %7, %17 : vector<8x64xf32>
    %19 = arith.truncf %18 : vector<8x64xf32> to vector<8x64xbf16>
    %c0_9 = arith.constant 0 : index
    %c0_10 = arith.constant 0 : index
    %20 = vector.load %arg4[%c0_9, %c0_10] : memref<64x32xbf16, #tpu.memory_space<vmem>>, vector<64x32xbf16>
    %cst_11 = arith.constant dense<0.000000e+00> : vector<8x32xf32>
    %21 = tpu.matmul %19, %20, %cst_11 {dimension_numbers = #tpu.dot_dimension_numbers<[1], [0], [0], [1], [0, 0, 1, 1], [], []>} : vector<8x64xbf16>, vector<64x32xbf16>, vector<8x32xf32> -> vector<8x32xf32>
    %c0_12 = arith.constant 0 : index
    %c0_13 = arith.constant 0 : index
    %22 = vector.load %arg5[%c0_12, %c0_13] : memref<1x32xf32, #tpu.memory_space<vmem>>, vector<1x32xf32>
    %23 = vector.broadcast %22 : vector<1x32xf32> to vector<8x32xf32>
    %24 = arith.addf %21, %23 : vector<8x32xf32>
    %25 = arith.extf %0 : vector<8x32xbf16> to vector<8x32xf32>
    %26 = arith.addf %24, %25 : vector<8x32xf32>
    %cst_14 = arith.constant dense<0.000000e+00> : vector<8xf32>
    %27 = vector.multi_reduction <add>, %26, %cst_14 [1] : vector<8x32xf32> to vector<8xf32>
    %28 = vector.shape_cast %27 : vector<8xf32> to vector<8x1xf32>
    %cst_15 = arith.constant 3.200000e+01 : f32
    %29 = vector.broadcast %cst_15 : f32 to vector<8x1xf32>
    %30 = arith.divf %28, %29 : vector<8x1xf32>
    %31 = vector.broadcast %30 : vector<8x1xf32> to vector<8x32xf32>
    %32 = arith.subf %26, %31 : vector<8x32xf32>
    %33 = arith.mulf %32, %32 : vector<8x32xf32>
    %cst_16 = arith.constant dense<0.000000e+00> : vector<8xf32>
    %34 = vector.multi_reduction <add>, %33, %cst_16 [1] : vector<8x32xf32> to vector<8xf32>
    %35 = vector.shape_cast %34 : vector<8xf32> to vector<8x1xf32>
    %cst_17 = arith.constant 3.200000e+01 : f32
    %36 = vector.broadcast %cst_17 : f32 to vector<8x1xf32>
    %37 = arith.divf %35, %36 : vector<8x1xf32>
    %38 = vector.broadcast %30 : vector<8x1xf32> to vector<8x32xf32>
    %39 = arith.subf %26, %38 : vector<8x32xf32>
    %cst_18 = arith.constant 9.99999996E-13 : f32
    %40 = vector.broadcast %cst_18 : f32 to vector<8x1xf32>
    %41 = arith.addf %37, %40 : vector<8x1xf32>
    %42 = math.rsqrt %41 : vector<8x1xf32>
    %43 = vector.broadcast %42 : vector<8x1xf32> to vector<8x32xf32>
    %44 = arith.mulf %39, %43 : vector<8x32xf32>
    %c0_19 = arith.constant 0 : index
    %c0_20 = arith.constant 0 : index
    %45 = vector.load %arg6[%c0_19, %c0_20] : memref<1x32xf32, #tpu.memory_space<vmem>>, vector<1x32xf32>
    %46 = vector.broadcast %45 : vector<1x32xf32> to vector<8x32xf32>
    %47 = arith.mulf %44, %46 : vector<8x32xf32>
    %c0_21 = arith.constant 0 : index
    %c0_22 = arith.constant 0 : index
    %48 = vector.load %arg7[%c0_21, %c0_22] : memref<1x32xf32, #tpu.memory_space<vmem>>, vector<1x32xf32>
    %49 = vector.broadcast %48 : vector<1x32xf32> to vector<8x32xf32>
    %50 = arith.addf %47, %49 : vector<8x32xf32>
    %51 = arith.truncf %50 : vector<8x32xf32> to vector<8x32xbf16>
    %c0_23 = arith.constant 0 : index
    %c0_24 = arith.constant 0 : index
    %52 = vector.load %arg8[%c0_23, %c0_24] : memref<8x32xbf16, #tpu.memory_space<vmem>>, vector<8x32xbf16>
    tpu.vector_store %arg8[%c0_23, %c0_24], %51 {strides = array<i32>} : memref<8x32xbf16, #tpu.memory_space<vmem>>, vector<8x32xbf16>,
    return
  }
  func.func @transform_0(%arg0: i32) -> (i32, i32) {
    %c0_i32 = arith.constant 0 : i32
    %c0_i32_0 = arith.constant 0 : i32
    return %arg0, %c0_i32 : i32, i32
  }
  func.func @transform_1(%arg0: i32) -> (i32, i32) {
    %c0_i32 = arith.constant 0 : i32
    %c0_i32_0 = arith.constant 0 : i32
    %c0_i32_1 = arith.constant 0 : i32
    return %c0_i32, %c0_i32_0 : i32, i32
  }
  func.func @transform_2(%arg0: i32) -> (i32, i32) {
    %c0_i32 = arith.constant 0 : i32
    %c0_i32_0 = arith.constant 0 : i32
    %c0_i32_1 = arith.constant 0 : i32
    return %c0_i32, %c0_i32_0 : i32, i32
  }
  func.func @transform_3(%arg0: i32) -> (i32, i32) {
    %c0_i32 = arith.constant 0 : i32
    %c0_i32_0 = arith.constant 0 : i32
    %c0_i32_1 = arith.constant 0 : i32
    return %c0_i32, %c0_i32_0 : i32, i32
  }
  func.func @transform_4(%arg0: i32) -> (i32, i32) {
    %c0_i32 = arith.constant 0 : i32
    %c0_i32_0 = arith.constant 0 : i32
    %c0_i32_1 = arith.constant 0 : i32
    return %c0_i32, %c0_i32_0 : i32, i32
  }
  func.func @transform_5(%arg0: i32) -> (i32, i32) {
    %c0_i32 = arith.constant 0 : i32
    %c0_i32_0 = arith.constant 0 : i32
    %c0_i32_1 = arith.constant 0 : i32
    return %c0_i32, %c0_i32_0 : i32, i32
  }
  func.func @transform_6(%arg0: i32) -> (i32, i32) {
    %c0_i32 = arith.constant 0 : i32
    %c0_i32_0 = arith.constant 0 : i32
    %c0_i32_1 = arith.constant 0 : i32
    return %c0_i32, %c0_i32_0 : i32, i32
  }
  func.func @transform_7(%arg0: i32) -> (i32, i32) {
    %c0_i32 = arith.constant 0 : i32
    %c0_i32_0 = arith.constant 0 : i32
    return %arg0, %c0_i32 : i32, i32
  }
}

module attributes {stable_mosaic.version = 11 : i64} {
  func.func @_ln_kernel(%arg0: i32, %arg1: memref<8x32xf32, #tpu.memory_space<vmem>>, %arg2: memref<1x32xf32, #tpu.memory_space<vmem>>, %arg3: memref<1x32xf32, #tpu.memory_space<vmem>>, %arg4: memref<8x32xbf16, #tpu.memory_space<vmem>>) attributes {dimension_semantics = [#tpu.dimension_semantics<parallel>], iteration_bounds = array<i64: 2>, scalar_prefetch = 0 : i64, scratch_operands = 0 : i64, tpu.core_type = #tpu.core_type<tc>, window_params = [{transform_indices = @transform_0, window_bounds = array<i64: 8, 32>}, {pipeline_mode = #tpu.pipeline_mode<synchronous>, transform_indices = @transform_1, window_bounds = array<i64: 1, 32>}, {pipeline_mode = #tpu.pipeline_mode<synchronous>, transform_indices = @transform_2, window_bounds = array<i64: 1, 32>}, {transform_indices = @transform_3, window_bounds = array<i64: 8, 32>}]} {
    %c0 = arith.constant 0 : index
    %c0_0 = arith.constant 0 : index
    %0 = vector.load %arg1[%c0, %c0_0] : memref<8x32xf32, #tpu.memory_space<vmem>>, vector<8x32xf32>
    %cst = arith.constant dense<0.000000e+00> : vector<8xf32>
    %1 = vector.multi_reduction <add>, %0, %cst [1] : vector<8x32xf32> to vector<8xf32>
    %2 = vector.shape_cast %1 : vector<8xf32> to vector<8x1xf32>
    %cst_1 = arith.constant 3.200000e+01 : f32
    %3 = vector.broadcast %cst_1 : f32 to vector<8x1xf32>
    %4 = arith.divf %2, %3 : vector<8x1xf32>
    %5 = vector.broadcast %4 : vector<8x1xf32> to vector<8x32xf32>
    %6 = arith.subf %0, %5 : vector<8x32xf32>
    %7 = arith.mulf %6, %6 : vector<8x32xf32>
    %cst_2 = arith.constant dense<0.000000e+00> : vector<8xf32>
    %8 = vector.multi_reduction <add>, %7, %cst_2 [1] : vector<8x32xf32> to vector<8xf32>
    %9 = vector.shape_cast %8 : vector<8xf32> to vector<8x1xf32>
    %cst_3 = arith.constant 3.200000e+01 : f32
    %10 = vector.broadcast %cst_3 : f32 to vector<8x1xf32>
    %11 = arith.divf %9, %10 : vector<8x1xf32>
    %12 = vector.broadcast %4 : vector<8x1xf32> to vector<8x32xf32>
    %13 = arith.subf %0, %12 : vector<8x32xf32>
    %cst_4 = arith.constant 9.99999996E-13 : f32
    %14 = vector.broadcast %cst_4 : f32 to vector<8x1xf32>
    %15 = arith.addf %11, %14 : vector<8x1xf32>
    %16 = math.rsqrt %15 : vector<8x1xf32>
    %17 = vector.broadcast %16 : vector<8x1xf32> to vector<8x32xf32>
    %18 = arith.mulf %13, %17 : vector<8x32xf32>
    %c0_5 = arith.constant 0 : index
    %c0_6 = arith.constant 0 : index
    %19 = vector.load %arg2[%c0_5, %c0_6] : memref<1x32xf32, #tpu.memory_space<vmem>>, vector<1x32xf32>
    %20 = vector.broadcast %19 : vector<1x32xf32> to vector<8x32xf32>
    %21 = arith.mulf %18, %20 : vector<8x32xf32>
    %c0_7 = arith.constant 0 : index
    %c0_8 = arith.constant 0 : index
    %22 = vector.load %arg3[%c0_7, %c0_8] : memref<1x32xf32, #tpu.memory_space<vmem>>, vector<1x32xf32>
    %23 = vector.broadcast %22 : vector<1x32xf32> to vector<8x32xf32>
    %24 = arith.addf %21, %23 : vector<8x32xf32>
    %25 = arith.truncf %24 : vector<8x32xf32> to vector<8x32xbf16>
    %c0_9 = arith.constant 0 : index
    %c0_10 = arith.constant 0 : index
    %26 = vector.load %arg4[%c0_9, %c0_10] : memref<8x32xbf16, #tpu.memory_space<vmem>>, vector<8x32xbf16>
    tpu.vector_store %arg4[%c0_9, %c0_10], %25 {strides = array<i32>} : memref<8x32xbf16, #tpu.memory_space<vmem>>, vector<8x32xbf16>,
    return
  }
  func.func @transform_0(%arg0: i32) -> (i32, i32) {
    %c0_i32 = arith.constant 0 : i32
    %c0_i32_0 = arith.constant 0 : i32
    return %arg0, %c0_i32 : i32, i32
  }
  func.func @transform_1(%arg0: i32) -> (i32, i32) {
    %c0_i32 = arith.constant 0 : i32
    %c0_i32_0 = arith.constant 0 : i32
    %c0_i32_1 = arith.constant 0 : i32
    return %c0_i32, %c0_i32_0 : i32, i32
  }
  func.func @transform_2(%arg0: i32) -> (i32, i32) {
    %c0_i32 = arith.constant 0 : i32
    %c0_i32_0 = arith.constant 0 : i32
    %c0_i32_1 = arith.constant 0 : i32
    return %c0_i32, %c0_i32_0 : i32, i32
  }
  func.func @transform_3(%arg0: i32) -> (i32, i32) {
    %c0_i32 = arith.constant 0 : i32
    %c0_i32_0 = arith.constant 0 : i32
    return %arg0, %c0_i32 : i32, i32
  }
}

module attributes {stable_mosaic.version = 11 : i64} {
  func.func @_attn_block_kernel(%arg0: i32, %arg1: memref<1x8x32xbf16, #tpu.memory_space<vmem>>, %arg2: memref<1x1x8xf32, #tpu.memory_space<vmem>>, %arg3: memref<4x32x24xbf16, #tpu.memory_space<vmem>>, %arg4: memref<4x1x24xf32, #tpu.memory_space<vmem>>, %arg5: memref<4x8x32xbf16, #tpu.memory_space<vmem>>, %arg6: memref<1x32xf32, #tpu.memory_space<vmem>>, %arg7: memref<1x32xf32, #tpu.memory_space<vmem>>, %arg8: memref<1x32xf32, #tpu.memory_space<vmem>>, %arg9: memref<1x8x32xbf16, #tpu.memory_space<vmem>>) attributes {dimension_semantics = [#tpu.dimension_semantics<parallel>], iteration_bounds = array<i64: 2>, scalar_prefetch = 0 : i64, scratch_operands = 0 : i64, tpu.core_type = #tpu.core_type<tc>, window_params = [{transform_indices = @transform_0, window_bounds = array<i64: 1, 8, 32>}, {transform_indices = @transform_1, window_bounds = array<i64: 1, 1, 8>}, {pipeline_mode = #tpu.pipeline_mode<synchronous>, transform_indices = @transform_2, window_bounds = array<i64: 4, 32, 24>}, {pipeline_mode = #tpu.pipeline_mode<synchronous>, transform_indices = @transform_3, window_bounds = array<i64: 4, 1, 24>}, {pipeline_mode = #tpu.pipeline_mode<synchronous>, transform_indices = @transform_4, window_bounds = array<i64: 4, 8, 32>}, {pipeline_mode = #tpu.pipeline_mode<synchronous>, transform_indices = @transform_5, window_bounds = array<i64: 1, 32>}, {pipeline_mode = #tpu.pipeline_mode<synchronous>, transform_indices = @transform_6, window_bounds = array<i64: 1, 32>}, {pipeline_mode = #tpu.pipeline_mode<synchronous>, transform_indices = @transform_7, window_bounds = array<i64: 1, 32>}, {transform_indices = @transform_8, window_bounds = array<i64: 1, 8, 32>}]} {
    %c0 = arith.constant 0 : index
    %c0_0 = arith.constant 0 : index
    %c0_1 = arith.constant 0 : index
    %0 = vector.load %arg1[%c0, %c0_0, %c0_1] : memref<1x8x32xbf16, #tpu.memory_space<vmem>>, vector<1x8x32xbf16>
    %1 = vector.shape_cast %0 : vector<1x8x32xbf16> to vector<8x32xbf16>
    %2 = vector.shape_cast %1 : vector<8x32xbf16> to vector<1x8x32xbf16>
    %3 = vector.shape_cast %2 : vector<1x8x32xbf16> to vector<1x8x32xbf16>
    %4 = vector.broadcast %3 : vector<1x8x32xbf16> to vector<4x8x32xbf16>
    %c0_2 = arith.constant 0 : index
    %c0_3 = arith.constant 0 : index
    %c0_4 = arith.constant 0 : index
    %5 = vector.load %arg3[%c0_2, %c0_3, %c0_4] : memref<4x32x24xbf16, #tpu.memory_space<vmem>>, vector<4x32x24xbf16>
    "tpu.trace_start"() <{level = 10 : i32, message = "nsh,nhe->nse"}> : () -> ()
    %cst = arith.constant dense<0.000000e+00> : vector<4x8x24xf32>
    %6 = tpu.matmul %4, %5, %cst {dimension_numbers = #tpu.dot_dimension_numbers<[2], [1], [1], [2], [0, 0, 0, 1, 1, 2], [0], [0]>} : vector<4x8x32xbf16>, vector<4x32x24xbf16>, vector<4x8x24xf32> -> vector<4x8x24xf32>
    "tpu.trace_stop"() : () -> ()
    %c0_5 = arith.constant 0 : index
    %c0_6 = arith.constant 0 : index
    %c0_7 = arith.constant 0 : index
    %7 = vector.load %arg4[%c0_5, %c0_6, %c0_7] : memref<4x1x24xf32, #tpu.memory_space<vmem>>, vector<4x1x24xf32>
    %8 = vector.broadcast %7 : vector<4x1x24xf32> to vector<4x8x24xf32>
    %9 = arith.addf %6, %8 : vector<4x8x24xf32>
    %10 = vector.extract_strided_slice %9 {offsets = [0, 0, 0], sizes = [4, 8, 8], strides = [1, 1, 1]} : vector<4x8x24xf32> to vector<4x8x8xf32>
    %11 = arith.truncf %10 : vector<4x8x8xf32> to vector<4x8x8xbf16>
    %12 = vector.extract_strided_slice %9 {offsets = [0, 0, 8], sizes = [4, 8, 8], strides = [1, 1, 1]} : vector<4x8x24xf32> to vector<4x8x8xf32>
    %13 = arith.truncf %12 : vector<4x8x8xf32> to vector<4x8x8xbf16>
    %14 = vector.extract_strided_slice %9 {offsets = [0, 0, 16], sizes = [4, 8, 8], strides = [1, 1, 1]} : vector<4x8x24xf32> to vector<4x8x8xf32>
    %15 = arith.truncf %14 : vector<4x8x8xf32> to vector<4x8x8xbf16>
    "tpu.trace_start"() <{level = 10 : i32, message = "nqd,nkd->nqk"}> : () -> ()
    %cst_8 = arith.constant dense<0.000000e+00> : vector<4x8x8xf32>
    %16 = tpu.matmul %11, %13, %cst_8 {dimension_numbers = #tpu.dot_dimension_numbers<[2], [2], [1], [1], [0, 0, 0, 1, 1, 1], [0], [0]>} : vector<4x8x8xbf16>, vector<4x8x8xbf16>, vector<4x8x8xf32> -> vector<4x8x8xf32>
    "tpu.trace_stop"() : () -> ()
    %cst_9 = arith.constant 0.353553385 : f32
    %17 = vector.broadcast %cst_9 : f32 to vector<4x8x8xf32>
    %18 = arith.mulf %16, %17 : vector<4x8x8xf32>
    %c0_10 = arith.constant 0 : index
    %c0_11 = arith.constant 0 : index
    %c0_12 = arith.constant 0 : index
    %19 = vector.load %arg2[%c0_10, %c0_11, %c0_12] : memref<1x1x8xf32, #tpu.memory_space<vmem>>, vector<1x1x8xf32>
    %20 = vector.broadcast %19 : vector<1x1x8xf32> to vector<4x8x8xf32>
    %21 = arith.addf %18, %20 : vector<4x8x8xf32>
    %cst_13 = arith.constant dense<0xFF800000> : vector<4x8xf32>
    %22 = vector.multi_reduction <maximumf>, %21, %cst_13 [2] : vector<4x8x8xf32> to vector<4x8xf32>
    %23 = vector.shape_cast %22 : vector<4x8xf32> to vector<4x8x1xf32>
    %24 = vector.broadcast %23 : vector<4x8x1xf32> to vector<4x8x8xf32>
    %25 = arith.subf %21, %24 : vector<4x8x8xf32>
    %26 = math.exp %25 : vector<4x8x8xf32>
    %cst_14 = arith.constant dense<0.000000e+00> : vector<4x8xf32>
    %27 = vector.multi_reduction <add>, %26, %cst_14 [2] : vector<4x8x8xf32> to vector<4x8xf32>
    %28 = vector.shape_cast %27 : vector<4x8xf32> to vector<4x8x1xf32>
    %29 = tpu.reciprocal %28 {approx = true} : vector<4x8x1xf32> -> vector<4x8x1xf32>
    %30 = vector.broadcast %29 : vector<4x8x1xf32> to vector<4x8x8xf32>
    %31 = arith.mulf %26, %30 : vector<4x8x8xf32>
    %32 = arith.truncf %31 : vector<4x8x8xf32> to vector<4x8x8xbf16>
    "tpu.trace_start"() <{level = 10 : i32, message = "nqk,nkd->nqd"}> : () -> ()
    %cst_15 = arith.constant dense<0.000000e+00> : vector<4x8x8xf32>
    %33 = tpu.matmul %32, %15, %cst_15 {dimension_numbers = #tpu.dot_dimension_numbers<[2], [1], [1], [2], [0, 0, 0, 1, 1, 2], [0], [0]>} : vector<4x8x8xbf16>, vector<4x8x8xbf16>, vector<4x8x8xf32> -> vector<4x8x8xf32>
    "tpu.trace_stop"() : () -> ()
    %34 = arith.truncf %33 : vector<4x8x8xf32> to vector<4x8x8xbf16>
    %c0_16 = arith.constant 0 : index
    %c0_17 = arith.constant 0 : index
    %c0_18 = arith.constant 0 : index
    %35 = vector.load %arg5[%c0_16, %c0_17, %c0_18] : memref<4x8x32xbf16, #tpu.memory_space<vmem>>, vector<4x8x32xbf16>
    "tpu.trace_start"() <{level = 10 : i32, message = "nqd,ndh->nqh"}> : () -> ()
    %cst_19 = arith.constant dense<0.000000e+00> : vector<4x8x32xf32>
    %36 = tpu.matmul %34, %35, %cst_19 {dimension_numbers = #tpu.dot_dimension_numbers<[2], [1], [1], [2], [0, 0, 0, 1, 1, 2], [0], [0]>} : vector<4x8x8xbf16>, vector<4x8x32xbf16>, vector<4x8x32xf32> -> vector<4x8x32xf32>
    "tpu.trace_stop"() : () -> ()
    %cst_20 = arith.constant dense<0.000000e+00> : vector<8x32xf32>
    %37 = vector.multi_reduction <add>, %36, %cst_20 [0] : vector<4x8x32xf32> to vector<8x32xf32>
    %c0_21 = arith.constant 0 : index
    %c0_22 = arith.constant 0 : index
    %38 = vector.load %arg6[%c0_21, %c0_22] : memref<1x32xf32, #tpu.memory_space<vmem>>, vector<1x32xf32>
    %39 = vector.broadcast %38 : vector<1x32xf32> to vector<8x32xf32>
    %40 = arith.addf %37, %39 : vector<8x32xf32>
    %41 = arith.extf %1 : vector<8x32xbf16> to vector<8x32xf32>
    %42 = arith.addf %40, %41 : vector<8x32xf32>
    %cst_23 = arith.constant dense<0.000000e+00> : vector<8xf32>
    %43 = vector.multi_reduction <add>, %42, %cst_23 [1] : vector<8x32xf32> to vector<8xf32>
    %44 = vector.shape_cast %43 : vector<8xf32> to vector<8x1xf32>
    %cst_24 = arith.constant 3.200000e+01 : f32
    %45 = vector.broadcast %cst_24 : f32 to vector<8x1xf32>
    %46 = arith.divf %44, %45 : vector<8x1xf32>
    %47 = vector.broadcast %46 : vector<8x1xf32> to vector<8x32xf32>
    %48 = arith.subf %42, %47 : vector<8x32xf32>
    %49 = arith.mulf %48, %48 : vector<8x32xf32>
    %cst_25 = arith.constant dense<0.000000e+00> : vector<8xf32>
    %50 = vector.multi_reduction <add>, %49, %cst_25 [1] : vector<8x32xf32> to vector<8xf32>
    %51 = vector.shape_cast %50 : vector<8xf32> to vector<8x1xf32>
    %cst_26 = arith.constant 3.200000e+01 : f32
    %52 = vector.broadcast %cst_26 : f32 to vector<8x1xf32>
    %53 = arith.divf %51, %52 : vector<8x1xf32>
    %54 = vector.broadcast %46 : vector<8x1xf32> to vector<8x32xf32>
    %55 = arith.subf %42, %54 : vector<8x32xf32>
    %cst_27 = arith.constant 9.99999996E-13 : f32
    %56 = vector.broadcast %cst_27 : f32 to vector<8x1xf32>
    %57 = arith.addf %53, %56 : vector<8x1xf32>
    %58 = math.rsqrt %57 : vector<8x1xf32>
    %59 = vector.broadcast %58 : vector<8x1xf32> to vector<8x32xf32>
    %60 = arith.mulf %55, %59 : vector<8x32xf32>
    %c0_28 = arith.constant 0 : index
    %c0_29 = arith.constant 0 : index
    %61 = vector.load %arg7[%c0_28, %c0_29] : memref<1x32xf32, #tpu.memory_space<vmem>>, vector<1x32xf32>
    %62 = vector.broadcast %61 : vector<1x32xf32> to vector<8x32xf32>
    %63 = arith.mulf %60, %62 : vector<8x32xf32>
    %c0_30 = arith.constant 0 : index
    %c0_31 = arith.constant 0 : index
    %64 = vector.load %arg8[%c0_30, %c0_31] : memref<1x32xf32, #tpu.memory_space<vmem>>, vector<1x32xf32>
    %65 = vector.broadcast %64 : vector<1x32xf32> to vector<8x32xf32>
    %66 = arith.addf %63, %65 : vector<8x32xf32>
    %67 = arith.truncf %66 : vector<8x32xf32> to vector<8x32xbf16>
    %c0_32 = arith.constant 0 : index
    %c0_33 = arith.constant 0 : index
    %c0_34 = arith.constant 0 : index
    %68 = vector.load %arg9[%c0_32, %c0_33, %c0_34] : memref<1x8x32xbf16, #tpu.memory_space<vmem>>, vector<1x8x32xbf16>
    %69 = vector.shape_cast %68 : vector<1x8x32xbf16> to vector<8x32xbf16>
    %70 = vector.shape_cast %67 : vector<8x32xbf16> to vector<1x8x32xbf16>
    tpu.vector_store %arg9[%c0_32, %c0_33, %c0_34], %70 {strides = array<i32>} : memref<1x8x32xbf16, #tpu.memory_space<vmem>>, vector<1x8x32xbf16>,
    return
  }
  func.func @transform_0(%arg0: i32) -> (i32, i32, i32) {
    %c0_i32 = arith.constant 0 : i32
    %c0_i32_0 = arith.constant 0 : i32
    %c0_i32_1 = arith.constant 0 : i32
    return %arg0, %c0_i32, %c0_i32_0 : i32, i32, i32
  }
  func.func @transform_1(%arg0: i32) -> (i32, i32, i32) {
    %c0_i32 = arith.constant 0 : i32
    %c0_i32_0 = arith.constant 0 : i32
    %c0_i32_1 = arith.constant 0 : i32
    return %arg0, %c0_i32, %c0_i32_0 : i32, i32, i32
  }
  func.func @transform_2(%arg0: i32) -> (i32, i32, i32) {
    %c0_i32 = arith.constant 0 : i32
    %c0_i32_0 = arith.constant 0 : i32
    %c0_i32_1 = arith.constant 0 : i32
    %c0_i32_2 = arith.constant 0 : i32
    return %c0_i32, %c0_i32_0, %c0_i32_1 : i32, i32, i32
  }
  func.func @transform_3(%arg0: i32) -> (i32, i32, i32) {
    %c0_i32 = arith.constant 0 : i32
    %c0_i32_0 = arith.constant 0 : i32
    %c0_i32_1 = arith.constant 0 : i32
    %c0_i32_2 = arith.constant 0 : i32
    return %c0_i32, %c0_i32_0, %c0_i32_1 : i32, i32, i32
  }
  func.func @transform_4(%arg0: i32) -> (i32, i32, i32) {
    %c0_i32 = arith.constant 0 : i32
    %c0_i32_0 = arith.constant 0 : i32
    %c0_i32_1 = arith.constant 0 : i32
    %c0_i32_2 = arith.constant 0 : i32
    return %c0_i32, %c0_i32_0, %c0_i32_1 : i32, i32, i32
  }
  func.func @transform_5(%arg0: i32) -> (i32, i32) {
    %c0_i32 = arith.constant 0 : i32
    %c0_i32_0 = arith.constant 0 : i32
    %c0_i32_1 = arith.constant 0 : i32
    return %c0_i32, %c0_i32_0 : i32, i32
  }
  func.func @transform_6(%arg0: i32) -> (i32, i32) {
    %c0_i32 = arith.constant 0 : i32
    %c0_i32_0 = arith.constant 0 : i32
    %c0_i32_1 = arith.constant 0 : i32
    return %c0_i32, %c0_i32_0 : i32, i32
  }
  func.func @transform_7(%arg0: i32) -> (i32, i32) {
    %c0_i32 = arith.constant 0 : i32
    %c0_i32_0 = arith.constant 0 : i32
    %c0_i32_1 = arith.constant 0 : i32
    return %c0_i32, %c0_i32_0 : i32, i32
  }
  func.func @transform_8(%arg0: i32) -> (i32, i32, i32) {
    %c0_i32 = arith.constant 0 : i32
    %c0_i32_0 = arith.constant 0 : i32
    %c0_i32_1 = arith.constant 0 : i32
    return %arg0, %c0_i32, %c0_i32_0 : i32, i32, i32
  }
}

module attributes {stable_mosaic.version = 11 : i64} {
  func.func @_linear_kernel(%arg0: i32, %arg1: memref<2x32xbf16, #tpu.memory_space<vmem>>, %arg2: memref<32x16xbf16, #tpu.memory_space<vmem>>, %arg3: memref<1x16xf32, #tpu.memory_space<vmem>>, %arg4: memref<2x16xf32, #tpu.memory_space<vmem>>) attributes {dimension_semantics = [#tpu.dimension_semantics<parallel>], iteration_bounds = array<i64: 1>, scalar_prefetch = 0 : i64, scratch_operands = 0 : i64, tpu.core_type = #tpu.core_type<tc>, window_params = [{transform_indices = @transform_0, window_bounds = array<i64: 2, 32>}, {pipeline_mode = #tpu.pipeline_mode<synchronous>, transform_indices = @transform_1, window_bounds = array<i64: 32, 16>}, {pipeline_mode = #tpu.pipeline_mode<synchronous>, transform_indices = @transform_2, window_bounds = array<i64: 1, 16>}, {transform_indices = @transform_3, window_bounds = array<i64: 2, 16>}]} {
    %c0 = arith.constant 0 : index
    %c0_0 = arith.constant 0 : index
    %0 = vector.load %arg1[%c0, %c0_0] : memref<2x32xbf16, #tpu.memory_space<vmem>>, vector<2x32xbf16>
    %c0_1 = arith.constant 0 : index
    %c0_2 = arith.constant 0 : index
    %1 = vector.load %arg2[%c0_1, %c0_2] : memref<32x16xbf16, #tpu.memory_space<vmem>>, vector<32x16xbf16>
    %cst = arith.constant dense<0.000000e+00> : vector<2x16xf32>
    %2 = tpu.matmul %0, %1, %cst {dimension_numbers = #tpu.dot_dimension_numbers<[1], [0], [0], [1], [0, 0, 1, 1], [], []>} : vector<2x32xbf16>, vector<32x16xbf16>, vector<2x16xf32> -> vector<2x16xf32>
    %c0_3 = arith.constant 0 : index
    %c0_4 = arith.constant 0 : index
    %3 = vector.load %arg3[%c0_3, %c0_4] : memref<1x16xf32, #tpu.memory_space<vmem>>, vector<1x16xf32>
    %4 = vector.broadcast %3 : vector<1x16xf32> to vector<2x16xf32>
    %5 = arith.addf %2, %4 : vector<2x16xf32>
    %c0_5 = arith.constant 0 : index
    %c0_6 = arith.constant 0 : index
    %6 = vector.load %arg4[%c0_5, %c0_6] : memref<2x16xf32, #tpu.memory_space<vmem>>, vector<2x16xf32>
    tpu.vector_store %arg4[%c0_5, %c0_6], %5 {strides = array<i32>} : memref<2x16xf32, #tpu.memory_space<vmem>>, vector<2x16xf32>,
    return
  }
  func.func @transform_0(%arg0: i32) -> (i32, i32) {
    %c0_i32 = arith.constant 0 : i32
    %c0_i32_0 = arith.constant 0 : i32
    return %arg0, %c0_i32 : i32, i32
  }
  func.func @transform_1(%arg0: i32) -> (i32, i32) {
    %c0_i32 = arith.constant 0 : i32
    %c0_i32_0 = arith.constant 0 : i32
    %c0_i32_1 = arith.constant 0 : i32
    return %c0_i32, %c0_i32_0 : i32, i32
  }
  func.func @transform_2(%arg0: i32) -> (i32, i32) {
    %c0_i32 = arith.constant 0 : i32
    %c0_i32_0 = arith.constant 0 : i32
    %c0_i32_1 = arith.constant 0 : i32
    return %c0_i32, %c0_i32_0 : i32, i32
  }
  func.func @transform_3(%arg0: i32) -> (i32, i32) {
    %c0_i32 = arith.constant 0 : i32
    %c0_i32_0 = arith.constant 0 : i32
    return %arg0, %c0_i32 : i32, i32
  }
}

</mosaic_0001>

<bundles_post_ra>
// kernel: entity_embedding_bert_forward.6
= control target key start
LH: loop header
LB: loop body
LE: loop exit
PB: predicated region body
PF: predicated region fallthrough
CT: control target
= control target key end

     0   :  { %s303_s12 = smov 0   ;;  %s326_s0 = inlined_call_operand.vmem [shape: f32[16,32], index: 0, kind: input, shape index: {}]   ;;  %s327_s1 = inlined_call_operand.vmem [shape: f32[1,32], index: 1, kind: input, shape index: {}]   ;;  %s328_s2 = inlined_call_operand.vmem [shape: f32[1,32], index: 2, kind: input, shape index: {}]   ;;  %s329_s3 = inlined_call_operand.vmem [shape: bf16[16,32], index: 3, kind: output, shape index: {}]  }
   0x1 LB: > { %s254_s13 = sadd.s32 4294967295, %s281_s12   ;;  %p258_p0 = scmp.ge.s32.totalorder %s281_s12, 1  ;;  %s281_s12 = sphi %s303_s12, %s13_s12  }
   0x2   : > { %p136_p1 = scmp.lt.s32.totalorder %s281_s12, 3 }
   0x4   : > { %p137_p2 = pnand %p258_p0, %p136_p1 }
   0x5   : > { %p158_p3 = scmp.lt.s32.totalorder (!%p137_p2), %s254_s13, 1 }
   0x6   : > { %140 = sbr.rel (%p137_p2) target bundleno = 326 (0x146), region = 32 }
   0xb   : > { %s331_s13 = smov (!%p158_p3, %s254_s13), 1  ;;  %vm167_vm0 = vcmask 261120   ;;  %v261_v11 = vld [vmem:[%s327_s1] ss:$0 sm:$0xff]  ;;  %vm199_vm1 = vcmask 257024  }
   0xc   : > { %s259_s14 = sshll.u32 %s331_s13, 3  ;;  %v262_v13 = vld [vmem:[%s328_s2] ss:$0 sm:$0xff]  ;;  %s260_s22 = sshll.u32 %s331_s13, 2 }
   0xd   : > { %s161_s17 = scalar_lea.vmem %s326_s0, %s259_s14  ;;  %s165_s25 = scalar_lea.vmem %s329_s3, %s260_s22 }
   0xe   : > { %v166_v0 = vld [vmem:[%s161_s17] sm:$0xff] }
   0xf   : > { %v168_v1 = vsel %vm167_vm0, %v166_v0, 0.0 }
  0x10   : > { %169 = vadd.xlane.f32.xlu0 %v168_v1 }
  0x99   : > { %v170_v2 = vpop.xlane.xlu0 %169 }
  0x9a   : > { %v172_v3 = vmul.f32 0.03125, %v170_v2 }
  0x9c   : > { %v173_v4 = vsub.f32 %v166_v0, %v172_v3 }
  0x9e   : > { %v174_v5 = vmul.f32 %v173_v4, %v173_v4 }
  0xa0   : > { %v175_v6 = vsel %vm167_vm0, %v174_v5, 0.0 }
  0xa1   : > { %176 = vadd.xlane.f32.xlu0 %v175_v6 }
 0x12a   : > { %v177_v7 = vpop.xlane.xlu0 %176 }
 0x12b   : > { %v178_v8 = vmul.f32 0.03125, %v177_v7 }
 0x12d   : > { %v179_v9 = vadd.f32 1e-12, %v178_v8 }
 0x12f   : > { %273 = vrsqrt.f32 %v179_v9 }
 0x13c   : > { %v274_v10 = vpop.eup %273 }
 0x13d   : > { %v181_v12 = vmul.f32 %v274_v10, %v173_v4 }
 0x13f   : > { %v189_v14 = vmul.f32 %v261_v11, %v181_v12 }
 0x141   : > { %v197_v15 = vadd.f32 %v262_v13, %v189_v14 }
 0x143   : > { %v198_v16 = vpack.c.bf16 %v197_v15, %v197_v15 }
 0x145   : > { %200 = vst.msk [vmem:[%s165_s25] sm:$0xf] %vm199_vm1, %v198_v16 }
 0x146 PF: > { %s13_s12 = sadd.s32 1, %s281_s12  }
 0x147   : > { %p10_p4 = scmp.ge.s32.totalorder %s13_s12, 4  }
 0x149   :  { %12 = sbr.rel (!%p10_p4) target bundleno = 1 (0x1), region = 62 }

// kernel: entity_embedding_bert_forward.11
= control target key start
LH: loop header
LB: loop body
LE: loop exit
PB: predicated region body
PF: predicated region fallthrough
CT: control target
= control target key end

     0   :  { %v142_v1 = vmov 0.0   ;;  %vm143_vm0 = vmmov 0   ;;  %s180_s0 = inlined_call_operand.vmem [shape: bf16[2,32], index: 0, kind: input, shape index: {}]   ;;  %s181_s1 = inlined_call_operand.vmem [shape: bf16[32,16], index: 1, kind: input, shape index: {}]   ;;  %s182_s2 = inlined_call_operand.vmem [shape: f32[1,16], index: 2, kind: input, shape index: {}]   ;;  %s183_s3 = inlined_call_operand.hbm [shape: f32[2,16], index: 3, kind: output, shape index: {}]  }
   0x1   :  { %v118_v0 = vld [vmem:[%s181_s1 + $0x8] sm:$0xff]   ;;  %107 = vmatprep.subr.bf16.mxu0 %v142_v1  ;;  %v119_v2 = vld [vmem:[%s181_s1] sm:$0xff]   ;;  %111 = vmatprep.mubr.msk.bf16.mxu0 %vm143_vm0, %v142_v1 }
   0x2   :  { %108 = vmatpush3.bf16.msra.mxu0 %v118_v0 }
   0x3   :  { %109 = vmatprep.subr.bf16.mxu0 %v142_v1 }
   0x4   :  { %8 = vsyncpa [#allocation3], 0  ;;  %v16_v3 = vld [vmem:[%s180_s0] sm:$0x1]  ;;  %vm40_vm1 = vcmask 261120   ;;  %s144_s20 = smov [#allocation2]  }
   0x5   :  { %v100_v4 = vld [vmem:[%s182_s2] ss:$0 sm:$0xff]  ;;  %s92_s21 = sshll.u32 %s144_s20, 4  ;;  %vm84_vm2 = vcmask 123904   ;;  %s93_s21 = int_to_ptr.vmem [resolvable:$true] %s92_s21 }
   0x6   :  { %110 = vmatpush3.bf16.msra.mxu0 %v119_v2  ;;  %s120_s1 = scalar_lea.vmem %s93_s21, 32  ;;  %p125_p1 = scmp.lt.s32.totalorder %s93_s21, %s93_s21 }
   0x7   :  { %p121_p0 = scmp.ne.s32.totalorder %s93_s21, %s120_s1  ;;  %p126_p2 = scmp.lt.s32.totalorder %s120_s1, %s120_s1 }
   0x9   :  { %112 = vmatmul.mubr.msk.bf16.vlgmr.msra.gmra.mxu0 %vm40_vm1, %v16_v3  ;;  %p127_p3 = por %p126_p2, %p125_p1 }
   0xb   :  { %p128_p4 = pnand %p127_p3, %p121_p0 }
  0xc9   :  { %v78_v5 = vpop.f32.mrf.mxu0 }
  0xca   :  { %v79_v6 = vadd.f32 %v100_v4, %v78_v5 }
  0xcb   :  { %v113_v7 = vpop.f32.mrf.mxu0 }
  0xcc   :  { %85 = vst.msk [vmem:[#allocation2] sm:$0x3] %vm84_vm2, %v79_v6 }
  0xcd   :  { %v81_v8 = vpop.f32.mrf.mxu0 }
  0xce   :  { %131 = shalt.err (!%p128_p4)
}
  0xcf   :  { %95 = dma.vmem_to_hbm [thread:$0]  %s93_s21, 32, %s183_s3, [#allocation3]   ;;  %v114_v9 = vpop.f32.mrf.mxu0 }
  0xd0   :  { %140 = dma.done.wait [#allocation3], 32  }
  0xd1   :  { %141 = vsyncadd [#allocation3], 4294967264 }
  0xd2   :  { %99 = vsyncpa [#allocation3], 1 }

// kernel: entity_embedding_bert_forward.8
= control target key start
LH: loop header
LB: loop body
LE: loop exit
PB: predicated region body
PF: predicated region fallthrough
CT: control target
= control target key end

     0   :  { %s643_s24 = smov 0   ;;  %s700_s0 = inlined_call_operand.vmem [shape: bf16[16,32], index: 0, kind: input, shape index: {}]   ;;  %s701_s1 = inlined_call_operand.vmem [shape: bf16[32,64], index: 1, kind: input, shape index: {}]   ;;  %s702_s2 = inlined_call_operand.vmem [shape: f32[1,64], index: 2, kind: input, shape index: {}]   ;;  %s703_s3 = inlined_call_operand.vmem [shape: bf16[64,32], index: 3, kind: input, shape index: {}]   ;;  %s704_s4 = inlined_call_operand.vmem [shape: f32[1,32], index: 4, kind: input, shape index: {}]   ;;  %s705_s5 = inlined_call_operand.vmem [shape: f32[1,32], index: 5, kind: input, shape index: {}]   ;;  %s706_s6 = inlined_call_operand.vmem [shape: f32[1,32], index: 6, kind: input, shape index: {}]   ;;  %s707_s7 = inlined_call_operand.vmem [shape: bf16[16,32], index: 7, kind: output, shape index: {}]  }
   0x1 LB: > { %s524_s25 = sadd.s32 4294967295, %s599_s24   ;;  %p528_p0 = scmp.ge.s32.totalorder %s599_s24, 1  ;;  %s599_s24 = sphi %s643_s24, %s17_s24  }
   0x2   : > { %p236_p1 = scmp.lt.s32.totalorder %s599_s24, 3 }
   0x4   : > { %p237_p2 = pnand %p528_p0, %p236_p1 }
   0x5   : > { %p266_p3 = scmp.lt.s32.totalorder (!%p237_p2), %s524_s25, 1 }
   0x6   : > { %240 = sbr.rel (%p237_p2) target bundleno = 753 (0x2f1), region = 48 }
   0xb   : > { %v583_v0 = vld [vmem:[%s701_s1 + $0x8] sm:$0xff]   ;;  %v601_v1 = vmov 0.0   ;;  %v584_v2 = vld [vmem:[%s701_s1] sm:$0xff]   ;;  %vm602_vm0 = vmmov 0   ;;  %s709_s25 = smov (!%p266_p3, %s524_s25), 1  ;;  %vm299_vm1 = vcmask 261120  }
   0xc   : > { %553 = vmatprep.subr.bf16.mxu0 %v601_v1  ;;  %561 = vmatprep.subr.bf16.mxu1 %v601_v1  ;;  %s529_s30 = sshll.u32 %s709_s25, 2  ;;  %v585_v4 = vld [vmem:[%s703_s3 + $0x18] sm:$0xff]   ;;  %v586_v5 = vld [vmem:[%s703_s3 + $0x10] sm:$0xff]   ;;  %v587_v6 = vld [vmem:[%s703_s3 + $0x8] sm:$0xff]   ;;  %vm392_vm2 = vcmask 523264   ;;  %vm469_vm3 = vcmask 257024  }
   0xd   : > { %554 = vmatpush3.bf16.msra.mxu0 %v583_v0  ;;  %557 = vmatprep.mubr.msk.bf16.mxu0 %vm602_vm0, %v601_v1  ;;  %s269_s10 = scalar_lea.vmem %s700_s0, %s529_s30  ;;  %v588_v7 = vld [vmem:[%s703_s3] sm:$0xff]   ;;  %s273_s9 = scalar_lea.vmem %s707_s7, %s529_s30 }
   0xe   : > { %555 = vmatprep.subr.bf16.mxu0 %v601_v1  ;;  %569 = vmatprep.mubr.msk.bf16.mxu1 %vm602_vm0, %v601_v1  ;;  %v275_v3 = vld [vmem:[%s269_s10] sm:$0xf] }
   0xf   : > { %562 = vmatpush3.bf16.msra.mxu1 %v585_v4  ;;  %v531_v8 = vld [vmem:[%s702_s2] ss:$0 sm:$0xff]  ;;  %v436_v25 = vunpack.c.l.bf16 %v275_v3 }
  0x10   : > { %563 = vmatprep.subr.bf16.mxu1 %v601_v1  ;;  %v535_v24 = vld [vmem:[%s704_s4] ss:$0 sm:$0xff] }
  0x11   : > { %556 = vmatpush3.bf16.msra.mxu0 %v584_v2  ;;  %v541_v42 = vld [vmem:[%s705_s5] ss:$0 sm:$0xff] }
  0x12   : > { %v542_v44 = vld [vmem:[%s706_s6] ss:$0 sm:$0xff] }
  0x13   : > { %564 = vmatpush3.bf16.msra.mxu1 %v586_v5 }
  0x14   : > { %558 = vmatmul.mubr.msk.bf16.vlgmr.msra.gmra.mxu0 %vm299_vm1, %v275_v3  ;;  %565 = vmatprep.subr.bf16.mxu1 %v601_v1 }
  0x17   : > { %566 = vmatpush3.bf16.msra.mxu1 %v587_v6 }
  0x18   : > { %567 = vmatprep.subr.bf16.mxu1 %v601_v1 }
  0x1b   : > { %568 = vmatpush3.bf16.msra.mxu1 %v588_v7 }
  0xd4   : > { %v337_v9 = vpop.f32.mrf.mxu0 }
  0xd5   : > { %v338_v10 = vadd.f32 %v531_v8, %v337_v9 }
  0xd6   : > { %v559_v11 = vpop.f32.mrf.mxu0 }
  0xd7   : > { %v344_v12 = vmul.f32 0.044715, %v338_v10  ;;  %v343_v20 = vmul.f32 0.5, %v338_v10 }
  0xd8   : > { %v340_v13 = vpop.f32.mrf.mxu0 }
  0xd9   : > { %v345_v14 = vmul.f32 %v344_v12, %v338_v10 }
  0xda   : > { %v560_v15 = vpop.f32.mrf.mxu0 }
  0xdb   : > { %v346_v16 = vmul.f32 %v345_v14, %v338_v10 }
  0xdd   : > { %v347_v17 = vadd.f32 %v346_v16, %v338_v10 }
  0xdf   : > { %v348_v18 = vmul.f32 0.7978846, %v347_v17 }
  0xe1   : > { %589 = vtanh.f32 %v348_v18 }
  0xee   : > { %v590_v19 = vpop.eup %589 }
  0xef   : > { %v350_v21 = vadd.f32 1.0, %v590_v19 }
  0xf1   : > { %v351_v22 = vmul.f32 %v350_v21, %v343_v20 }
  0xf3   : > { %v352_v23 = vpack.c.bf16 %v351_v22, %v351_v22 }
  0xf5   : > { %570 = vmatmul.mubr.msk.bf16.vlgmr.msra.gmra.mxu1 %vm392_vm2, %v352_v23 }
 0x1b5   : > { %v430_v26 = vpop.f32.mrf.mxu1 }
 0x1b6   : > { %v431_v27 = vadd.f32 %v535_v24, %v430_v26 }
 0x1b7   : > { %v571_v28 = vpop.f32.mrf.mxu1 }
 0x1b8   : > { %v437_v29 = vadd.f32 %v436_v25, %v431_v27 }
 0x1b9   : > { %v433_v30 = vpop.f32.mrf.mxu1 }
 0x1ba   : > { %v438_v31 = vsel %vm299_vm1, %v437_v29, 0.0 }
 0x1bb   : > { %439 = vadd.xlane.f32.xlu0 %v438_v31  ;;  %v572_v32 = vpop.f32.mrf.mxu1 }
 0x244   : > { %v440_v33 = vpop.xlane.xlu0 %439 }
 0x245   : > { %v442_v34 = vmul.f32 0.03125, %v440_v33 }
 0x247   : > { %v443_v35 = vsub.f32 %v437_v29, %v442_v34 }
 0x249   : > { %v444_v36 = vmul.f32 %v443_v35, %v443_v35 }
 0x24b   : > { %v445_v37 = vsel %vm299_vm1, %v444_v36, 0.0 }
 0x24c   : > { %446 = vadd.xlane.f32.xlu0 %v445_v37 }
 0x2d5   : > { %v447_v38 = vpop.xlane.xlu0 %446 }
 0x2d6   : > { %v448_v39 = vmul.f32 0.03125, %v447_v38 }
 0x2d8   : > { %v449_v40 = vadd.f32 1e-12, %v448_v39 }
 0x2da   : > { %591 = vrsqrt.f32 %v449_v40 }
 0x2e7   : > { %v592_v41 = vpop.eup %591 }
 0x2e8   : > { %v451_v43 = vmul.f32 %v592_v41, %v443_v35 }
 0x2ea   : > { %v459_v45 = vmul.f32 %v541_v42, %v451_v43 }
 0x2ec   : > { %v467_v46 = vadd.f32 %v542_v44, %v459_v45 }
 0x2ee   : > { %v468_v47 = vpack.c.bf16 %v467_v46, %v467_v46 }
 0x2f0   : > { %470 = vst.msk [vmem:[%s273_s9] sm:$0xf] %vm469_vm3, %v468_v47 }
 0x2f1 PF: > { %s17_s24 = sadd.s32 1, %s599_s24  }
 0x2f2   : > { %p14_p4 = scmp.ge.s32.totalorder %s17_s24, 4  }
 0x2f4   :  { %16 = sbr.rel (!%p14_p4) target bundleno = 1 (0x1), region = 78 }

// kernel: entity_embedding_bert_forward.7
= control target key start
LH: loop header
LB: loop body
LE: loop exit
PB: predicated region body
PF: predicated region fallthrough
CT: control target
= control target key end

     0   :  { %s1610_s27 = smov 0   ;;  %s1820_s0 = inlined_call_operand.vmem [shape: bf16[2,8,32], index: 0, kind: input, shape index: {}]   ;;  %s1821_s1 = inlined_call_operand.vmem [shape: f32[2,1,8], index: 1, kind: input, shape index: {}]   ;;  %s1822_s2 = inlined_call_operand.vmem [shape: bf16[4,32,24], index: 2, kind: input, shape index: {}]   ;;  %s1823_s3 = inlined_call_operand.vmem [shape: f32[4,1,24], index: 3, kind: input, shape index: {}]   ;;  %s1824_s4 = inlined_call_operand.vmem [shape: bf16[4,8,32], index: 4, kind: input, shape index: {}]   ;;  %s1825_s5 = inlined_call_operand.vmem [shape: f32[1,32], index: 5, kind: input, shape index: {}]   ;;  %s1826_s6 = inlined_call_operand.vmem [shape: f32[1,32], index: 6, kind: input, shape index: {}]   ;;  %s1827_s7 = inlined_call_operand.vmem [shape: f32[1,32], index: 7, kind: input, shape index: {}]   ;;  %s1828_s8 = inlined_call_operand.vmem [shape: bf16[2,8,32], index: 8, kind: output, shape index: {}]  }
   0x1 LB: > { %s1334_s28 = sadd.s32 4294967295, %s1559_s27   ;;  %p1338_p0 = scmp.ge.s32.totalorder %s1559_s27, 1  ;;  %s1559_s27 = sphi %s1610_s27, %s18_s27  }
   0x2   : > { %p269_p1 = scmp.lt.s32.totalorder %s1559_s27, 3 }
   0x4   : > { %p270_p2 = pnand %p1338_p0, %p269_p1 }
   0x5   : > { %p304_p3 = scmp.lt.s32.totalorder (!%p270_p2), %s1334_s28, 1  ;;  %s1563_s11 = smov (!%p270_p2), 120  }
   0x6   : > { %273 = sbr.rel (%p270_p2) target bundleno = 1569 (0x621), region = 52 }
   0xb   : > { %v1527_v0 = vld [vmem:[%s1822_s2 + $0x8] sm:$0xff]   ;;  %v1561_v1 = vmov 0.0   ;;  %v1528_v2 = vld [vmem:[%s1822_s2 + $0x18] sm:$0xff]   ;;  %v1529_v3 = vld [vmem:[%s1822_s2] sm:$0xff]   ;;  %vm1562_vm0 = vmmov 0   ;;  %s1830_s28 = smov (!%p304_p3, %s1334_s28), 1 }
   0xc   : > { %1411 = vmatprep.subr.bf16.mxu0 %v1561_v1  ;;  %1419 = vmatprep.subr.bf16.mxu1 %v1561_v1  ;;  %v1530_v4 = vld [vmem:[%s1822_s2 + $0x10] sm:$0xff]   ;;  %vm373_vm1 = vcmask 261120   ;;  %s1339_s15 = sshll.u32 %s1830_s28, 2  ;;  %v1531_v5 = vld [vmem:[%s1822_s2 + $0x28] sm:$0xff]   ;;  %v1532_v6 = vld [vmem:[%s1822_s2 + $0x38] sm:$0xff]   ;;  %vm580_vm2 = vcmask 64512   ;;  %s310_s19 = scalar_lea.vmem %s1821_s1, %s1830_s28 }
   0xd   : > { %1412 = vmatpush3.bf16.msra.mxu0 %v1527_v0  ;;  %1415 = vmatprep.mubr.msk.bf16.mxu0 %vm1562_vm0, %v1561_v1  ;;  %s307_s20 = scalar_lea.vmem %s1820_s0, %s1339_s15  ;;  %v1533_v8 = vld [vmem:[%s1822_s2 + $0x20] sm:$0xff]   ;;  %v1534_v9 = vld [vmem:[%s1822_s2 + $0x30] sm:$0xff]   ;;  %vm842_vm3 = vcmask 1043456   ;;  %s314_s18 = scalar_lea.vmem %s1828_s8, %s1339_s15  ;;  %vm1270_vm4 = vcmask 257024  }
   0xe   : > { %1420 = vmatpush3.bf16.msra.mxu1 %v1528_v2  ;;  %1413 = vmatprep.subr.bf16.mxu0 %v1561_v1  ;;  %v1653_v7 = vld [vmem:[%s307_s20] sm:$0xf]  ;;  %s1564_s20 = smov 112  }
   0xf   : > { %1421 = vmatprep.subr.bf16.mxu1 %v1561_v1  ;;  %1423 = vmatprep.mubr.msk.bf16.mxu1 %vm1562_vm0, %v1561_v1  ;;  %v1341_v10 = vld [vmem:[%s1823_s3] ss:$0 sm:$0xff]  ;;  %v1342_v11 = vld [vmem:[%s1823_s3 + $0x1] ss:$0 sm:$0xff]  ;;  %v1343_v23 = vld [vmem:[%s1823_s3 + $0x2] ss:$0 sm:$0xff] }
  0x10   : > { %v1344_v25 = vld [vmem:[%s1823_s3 + $0x3] ss:$0 sm:$0xff]  ;;  %v1361_v47 = vld [vmem:[%s310_s19] ss:$0 sm:$0xff] }
  0x11   : > { %1414 = vmatpush3.bf16.msra.mxu0 %v1529_v3 }
  0x12   : > { %1422 = vmatpush3.bf16.msra.mxu1 %v1530_v4  ;;  %1427 = vmatprep.subr.bf16.mxu0 %v1561_v1 }
  0x13   : > { %1435 = vmatprep.subr.bf16.mxu1 %v1561_v1 }
  0x14   : > { %1416 = vmatmul.mubr.msk.bf16.vlgmr.msra.gmra.mxu0 %vm373_vm1, %v1653_v7 }
  0x15   : > { %1424 = vmatmul.mubr.msk.bf16.vlgmr.msra.gmra.mxu1 %vm373_vm1, %v1653_v7  ;;  %1428 = vmatpush3.bf16.msra.mxu0 %v1531_v5 }
  0x16   : > { %1436 = vmatpush3.bf16.msra.mxu1 %v1532_v6  ;;  %1429 = vmatprep.subr.bf16.mxu0 %v1561_v1 }
  0x17   : > { %1437 = vmatprep.subr.bf16.mxu1 %v1561_v1  ;;  %1431 = vmatprep.mubr.msk.bf16.mxu0 %vm1562_vm0, %v1561_v1 }
  0x18   : > { %1439 = vmatprep.mubr.msk.bf16.mxu1 %vm1562_vm0, %v1561_v1 }
  0x19   : > { %1430 = vmatpush3.bf16.msra.mxu0 %v1533_v8 }
  0x1a   : > { %1438 = vmatpush3.bf16.msra.mxu1 %v1534_v9  ;;  %1443 = vmatprep.subr.bf16.mxu0 %v1561_v1 }
  0x1b   : > { %1449 = vmatprep.subr.bf16.mxu1 %v1561_v1 }
  0x1c   : > { %1432 = vmatmul.mubr.msk.bf16.vlgmr.msra.gmra.mxu0 %vm373_vm1, %v1653_v7 }
  0x1d   : > { %1440 = vmatmul.mubr.msk.bf16.vlgmr.msra.gmra.mxu1 %vm373_vm1, %v1653_v7  ;;  %1445 = vmatprep.mubr.msk.bf16.mxu0 %vm1562_vm0, %v1561_v1 }
  0x1e   : > { %1451 = vmatprep.mubr.msk.bf16.mxu1 %vm1562_vm0, %v1561_v1 }
  0xd4   : > { %v411_v12 = vpop.f32.mrf.mxu0 }
  0xd5   : > { %v412_v13 = vadd.f32 %v1341_v10, %v411_v12  ;;  %v463_v14 = vpop.f32.mrf.mxu1 }
  0xd6   : > { %v464_v15 = vadd.f32 %v1342_v11, %v463_v14  ;;  %v1417_v16 = vpop.f32.mrf.mxu0 }
  0xd7   : > { %v1688_v17 = vpack.c.bf16 %v412_v13, %v412_v13  ;;  %v1425_v18 = vpop.f32.mrf.mxu1 }
  0xd8   : > { %v414_v19 = vpop.f32.mrf.mxu0  ;;  %v1690_v20 = vpack.c.bf16 %v464_v15, %v464_v15 }
  0xd9   : > { %v466_v21 = vpop.f32.mrf.mxu1  ;;  %578 = vrot.lane.b32.xlu0 %v1688_v17, %s1563_s11 }
  0xda   : > { %v1418_v22 = vpop.f32.mrf.mxu0 }
  0xdb   : > { %v1426_v24 = vpop.f32.mrf.mxu1 }
  0xdc   : > { %v515_v26 = vpop.f32.mrf.mxu0 }
  0xdd   : > { %v516_v27 = vadd.f32 %v1343_v23, %v515_v26  ;;  %v567_v28 = vpop.f32.mrf.mxu1  ;;  %628 = vrot.lane.b32.xlu0 %v1690_v20, %s1563_s11 }
  0xde   : > { %v568_v29 = vadd.f32 %v1344_v25, %v567_v28  ;;  %v1433_v30 = vpop.f32.mrf.mxu0 }
  0xdf   : > { %v1700_v31 = vpack.c.bf16 %v516_v27, %v516_v27  ;;  %v1441_v32 = vpop.f32.mrf.mxu1 }
  0xe0   : > { %v518_v33 = vpop.f32.mrf.mxu0  ;;  %v1702_v34 = vpack.c.bf16 %v568_v29, %v568_v29 }
  0xe1   : > { %v570_v35 = vpop.f32.mrf.mxu1  ;;  %677 = vrot.lane.b32.xlu1 %v1700_v31, %s1563_s11 }
  0xe2   : > { %v1434_v36 = vpop.f32.mrf.mxu0 }
  0xe3   : > { %v1442_v37 = vpop.f32.mrf.mxu1 }
  0xe5   : > { %726 = vrot.lane.b32.xlu1 %v1702_v34, %s1563_s11 }
 0x14b   : > { %v579_v38 = vpop.permute.xlu0 %578 }
 0x14c   : > { %v585_v39 = vsel %vm580_vm2, %v579_v38, 0 }
 0x14d   : > { %1444 = vmatpush3.bf16.xpose.msra.mxu0 %v585_v39 }
 0x14e   : > { %1455 = vmatprep.subr.bf16.mxu0 %v1561_v1 }
 0x14f   : > { %v629_v40 = vpop.permute.xlu0 %628 }
 0x150   : > { %v634_v41 = vsel %vm580_vm2, %v629_v40, 0 }
 0x151   : > { %1450 = vmatpush3.bf16.xpose.msra.mxu1 %v634_v41 }
 0x152   : > { %1461 = vmatprep.subr.bf16.mxu1 %v1561_v1 }
 0x153   : > { %v678_v42 = vpop.permute.xlu1 %677 }
 0x154   : > { %v683_v43 = vsel %vm580_vm2, %v678_v42, 0  ;;  %1446 = vmatmul.mubr.msk.bf16.vlgmr.msra.gmra.mxu0 %vm580_vm2, %v1688_v17 }
 0x155   : > { %1456 = vmatpush3.bf16.xpose.msra.mxu0 %v683_v43  ;;  %1457 = vmatprep.mubr.msk.bf16.mxu0 %vm1562_vm0, %v1561_v1 }
 0x156   : > { %1467 = vmatprep.subr.bf16.mxu0 %v1561_v1 }
 0x157   : > { %v727_v44 = vpop.permute.xlu1 %726 }
 0x158   : > { %v732_v45 = vsel %vm580_vm2, %v727_v44, 0  ;;  %1452 = vmatmul.mubr.msk.bf16.vlgmr.msra.gmra.mxu1 %vm580_vm2, %v1690_v20 }
 0x159   : > { %1462 = vmatpush3.bf16.xpose.msra.mxu1 %v732_v45  ;;  %1463 = vmatprep.mubr.msk.bf16.mxu1 %vm1562_vm0, %v1561_v1 }
 0x15a   : > { %1473 = vmatprep.subr.bf16.mxu1 %v1561_v1 }
 0x15c   : > { %1458 = vmatmul.mubr.msk.bf16.vlgmr.msra.gmra.mxu0 %vm580_vm2, %v1700_v31 }
 0x15d   : > { %1469 = vmatprep.mubr.msk.bf16.mxu0 %vm1562_vm0, %v1561_v1 }
 0x160   : > { %1464 = vmatmul.mubr.msk.bf16.vlgmr.msra.gmra.mxu1 %vm580_vm2, %v1702_v34 }
 0x161   : > { %1475 = vmatprep.mubr.msk.bf16.mxu1 %vm1562_vm0, %v1561_v1 }
 0x214   : > { %v621_v46 = vpop.f32.mrf.mxu0 }
 0x215   : > { %v774_v48 = vmul.f32 0.35355338, %v621_v46 }
 0x216   : > { %v1447_v49 = vpop.f32.mrf.mxu0 }
 0x217   : > { %v785_v50 = vadd.f32 %v1361_v47, %v774_v48 }
 0x218   : > { %v624_v51 = vpop.f32.mrf.mxu0  ;;  %v670_v52 = vpop.f32.mrf.mxu1 }
 0x219   : > { %v775_v53 = vmul.f32 0.35355338, %v670_v52  ;;  %v789_v54 = vsel %vm580_vm2, %v785_v50, -inf }
 0x21a   : > { %v1453_v55 = vpop.f32.mrf.mxu1  ;;  %790 = vmax.xlane.f32.xlu0 %v789_v54  ;;  %v1448_v56 = vpop.f32.mrf.mxu0 }
 0x21b   : > { %v786_v57 = vadd.f32 %v1361_v47, %v775_v53 }
 0x21c   : > { %v673_v58 = vpop.f32.mrf.mxu1  ;;  %v719_v59 = vpop.f32.mrf.mxu0 }
 0x21d   : > { %v776_v60 = vmul.f32 0.35355338, %v719_v59  ;;  %v792_v61 = vsel %vm580_vm2, %v786_v57, -inf  ;;  %v1035_v59 = vld [vmem:[%s1824_s4 + $0x4] sm:$0xf] }
 0x21e   : > { %v1454_v62 = vpop.f32.mrf.mxu1  ;;  %793 = vmax.xlane.f32.xlu1 %v792_v61  ;;  %v1459_v63 = vpop.f32.mrf.mxu0  ;;  %v1036_v61 = vld [vmem:[%s1824_s4 + $0x8] sm:$0xf] }
 0x21f   : > { %v787_v0 = vadd.f32 %v1361_v47, %v776_v60  ;;  %v1088_v60 = vsel %vm842_vm3, %v1035_v59, 0 }
 0x220   : > { %v722_v2 = vpop.f32.mrf.mxu0  ;;  %v768_v3 = vpop.f32.mrf.mxu1 }
 0x221   : > { %v777_v4 = vmul.f32 0.35355338, %v768_v3  ;;  %v795_v5 = vsel %vm580_vm2, %v787_v0, -inf  ;;  %v1037_v3 = vld [vmem:[%s1824_s4 + $0xc] sm:$0xf] }
 0x222   : > { %v1465_v6 = vpop.f32.mrf.mxu1  ;;  %796 = vmax.xlane.f32.xlu0 %v795_v5  ;;  %v1460_v8 = vpop.f32.mrf.mxu0 }
 0x223   : > { %v788_v9 = vadd.f32 %v1361_v47, %v777_v4  ;;  %v1180_v8 = vsel %vm842_vm3, %v1037_v3, 0 }
 0x224   : > { %v771_v10 = vpop.f32.mrf.mxu1 }
 0x225   : > { %v798_v11 = vsel %vm580_vm2, %v788_v9, -inf }
 0x226   : > { %v1466_v12 = vpop.f32.mrf.mxu1  ;;  %799 = vmax.xlane.f32.xlu0 %v798_v11 }
 0x22f   : > { %837 = vrot.lane.b32.xlu1 %v1688_v17, %s1564_s20 }
 0x2a3   : > { %v791_v13 = vpop.xlane.xlu0 %790 }
 0x2a4   : > { %v801_v14 = vsub.f32 %v785_v50, %v791_v13 }
 0x2a6   : > { %v805_v15 = vmul.f32 1.442695, %v801_v14 }
 0x2a7   : > { %v794_v16 = vpop.xlane.xlu1 %793 }
 0x2a8   : > { %1535 = vpow2.f32 %v805_v15  ;;  %v802_v18 = vsub.f32 %v786_v57, %v794_v16  ;;  %v1034_v57 = vld [vmem:[%s1824_s4] sm:$0xf] }
 0x2a9   : > { %v1042_v58 = vsel %vm842_vm3, %v1034_v57, 0 }
 0x2aa   : > { %v807_v19 = vmul.f32 1.442695, %v802_v18 }
 0x2ab   : > { %v838_v21 = vpop.permute.xlu1 %837  ;;  %v797_v22 = vpop.xlane.xlu0 %796 }
 0x2ac   : > { %1537 = vpow2.f32 %v807_v19  ;;  %v844_v23 = vsel %vm842_vm3, %v838_v21, 0  ;;  %v803_v24 = vsub.f32 %v787_v0, %v797_v22  ;;  %v1134_v0 = vsel %vm842_vm3, %v1036_v61, 0 }
 0x2ad   : > { %1468 = vmatpush3.bf16.msra.mxu0 %v844_v23 }
 0x2ae   : > { %v809_v25 = vmul.f32 1.442695, %v803_v24  ;;  %1479 = vmatprep.subr.bf16.mxu0 %v1561_v1 }
 0x2af   : > { %v800_v26 = vpop.xlane.xlu0 %799 }
 0x2b0   : > { %1539 = vpow2.f32 %v809_v25  ;;  %v804_v17 = vsub.f32 %v788_v9, %v800_v26 }
 0x2b2   : > { %v811_v27 = vmul.f32 1.442695, %v804_v17 }
 0x2b4   : > { %1541 = vpow2.f32 %v811_v27 }
 0x2b5   : > { %v1536_v28 = vpop.eup %1535 }
 0x2b6   : > { %v813_v29 = vsel %vm580_vm2, %v1536_v28, 0.0 }
 0x2b7   : > { %814 = vadd.xlane.f32.xlu1 %v813_v29 }
 0x2b9   : > { %v1538_v30 = vpop.eup %1537 }
 0x2ba   : > { %v816_v32 = vsel %vm580_vm2, %v1538_v30, 0.0 }
 0x2bb   : > { %817 = vadd.xlane.f32.xlu0 %v816_v32 }
 0x2bd   : > { %v1540_v33 = vpop.eup %1539 }
 0x2be   : > { %v819_v35 = vsel %vm580_vm2, %v1540_v33, 0.0 }
 0x2bf   : > { %820 = vadd.xlane.f32.xlu1 %v819_v35 }
 0x2c1   : > { %v1542_v36 = vpop.eup %1541 }
 0x2c2   : > { %v822_v37 = vsel %vm580_vm2, %v1542_v36, 0.0 }
 0x2c3   : > { %823 = vadd.xlane.f32.xlu0 %v822_v37 }
 0x2d0   : > { %934 = vrot.lane.b32.xlu1 %v1700_v31, %s1564_s20 }
 0x2d4   : > { %982 = vrot.lane.b32.xlu1 %v1702_v34, %s1564_s20 }
 0x2d9   : > { %886 = vrot.lane.b32.xlu0 %v1690_v20, %s1564_s20 }
 0x340   : > { %v815_v38 = vpop.xlane.xlu1 %814 }
 0x341   : > { %1543 = vrcp.f32 %v815_v38 }
 0x344   : > { %v818_v39 = vpop.xlane.xlu0 %817 }
 0x345   : > { %1545 = vrcp.f32 %v818_v39 }
 0x348   : > { %v821_v40 = vpop.xlane.xlu1 %820 }
 0x349   : > { %1547 = vrcp.f32 %v821_v40 }
 0x34c   : > { %v824_v41 = vpop.xlane.xlu0 %823  ;;  %v935_v43 = vpop.permute.xlu1 %934 }
 0x34d   : > { %1549 = vrcp.f32 %v824_v41  ;;  %v940_v34 = vsel %vm842_vm3, %v935_v43, 0  ;;  %v1370_v43 = vld [vmem:[%s1825_s5] ss:$0 sm:$0xff] }
 0x34e   : > { %v1544_v42 = vpop.eup %1543 }
 0x34f   : > { %v829_v44 = vmul.f32 %v1544_v42, %v1536_v28 }
 0x350   : > { %v887_v45 = vpop.permute.xlu0 %886  ;;  %v983_v48 = vpop.permute.xlu1 %982 }
 0x351   : > { %v892_v31 = vsel %vm842_vm3, %v887_v45, 0  ;;  %v833_v46 = vpack.c.bf16 %v829_v44, %v829_v44  ;;  %v988_v51 = vsel %vm842_vm3, %v983_v48, 0 }
 0x352   : > { %v1546_v47 = vpop.eup %1545  ;;  %1474 = vmatpush3.bf16.msra.mxu1 %v892_v31 }
 0x353   : > { %1470 = vmatmul.mubr.msk.bf16.vlgmr.msra.gmra.mxu0 %vm580_vm2, %v833_v46  ;;  %1485 = vmatprep.subr.bf16.mxu1 %v1561_v1  ;;  %v830_v20 = vmul.f32 %v1546_v47, %v1538_v30  ;;  %v1237_v46 = vunpack.c.l.bf16 %v1653_v7 }
 0x354   : > { %1480 = vmatpush3.bf16.msra.mxu0 %v940_v34  ;;  %1481 = vmatprep.mubr.msk.bf16.mxu0 %vm1562_vm0, %v1561_v1 }
 0x355   : > { %v834_v49 = vpack.c.bf16 %v830_v20, %v830_v20  ;;  %1491 = vmatprep.subr.bf16.mxu0 %v1561_v1 }
 0x356   : > { %v1548_v50 = vpop.eup %1547 }
 0x357   : > { %1476 = vmatmul.mubr.msk.bf16.vlgmr.msra.gmra.mxu1 %vm580_vm2, %v834_v49  ;;  %v831_v52 = vmul.f32 %v1548_v50, %v1540_v33 }
 0x358   : > { %1486 = vmatpush3.bf16.msra.mxu1 %v988_v51  ;;  %1487 = vmatprep.mubr.msk.bf16.mxu1 %vm1562_vm0, %v1561_v1 }
 0x359   : > { %v835_v53 = vpack.c.bf16 %v831_v52, %v831_v52  ;;  %1497 = vmatprep.subr.bf16.mxu1 %v1561_v1 }
 0x35a   : > { %v1550_v54 = vpop.eup %1549 }
 0x35b   : > { %1482 = vmatmul.mubr.msk.bf16.vlgmr.msra.gmra.mxu0 %vm580_vm2, %v835_v53  ;;  %v832_v55 = vmul.f32 %v1550_v54, %v1542_v36 }
 0x35c   : > { %1493 = vmatprep.mubr.msk.bf16.mxu0 %vm1562_vm0, %v1561_v1  ;;  %1492 = vmatpush3.bf16.msra.mxu0 %v1042_v58  ;;  %v1371_v58 = vld [vmem:[%s1826_s6] ss:$0 sm:$0xff] }
 0x35d   : > { %v836_v56 = vpack.c.bf16 %v832_v55, %v832_v55  ;;  %1503 = vmatprep.subr.bf16.mxu0 %v1561_v1 }
 0x35f   : > { %1488 = vmatmul.mubr.msk.bf16.vlgmr.msra.gmra.mxu1 %vm580_vm2, %v836_v56 }
 0x360   : > { %1499 = vmatprep.mubr.msk.bf16.mxu1 %vm1562_vm0, %v1561_v1  ;;  %1498 = vmatpush3.bf16.msra.mxu1 %v1088_v60  ;;  %v1372_v60 = vld [vmem:[%s1827_s7] ss:$0 sm:$0xff] }
 0x361   : > { %1509 = vmatprep.subr.bf16.mxu1 %v1561_v1 }
 0x413   : > { %v880_v62 = vpop.f32.mrf.mxu0 }
 0x414   : > { %v1030_v63 = vpack.c.bf16 %v880_v62, %v880_v62 }
 0x415   : > { %v1471_v2 = vpop.f32.mrf.mxu0 }
 0x416   : > { %1494 = vmatmul.mubr.msk.bf16.vlgmr.msra.gmra.mxu0 %vm580_vm2, %v1030_v63 }
 0x417   : > { %v883_v4 = vpop.f32.mrf.mxu0  ;;  %v928_v5 = vpop.f32.mrf.mxu1  ;;  %1504 = vmatpush3.bf16.msra.mxu0 %v1134_v0  ;;  %1505 = vmatprep.mubr.msk.bf16.mxu0 %vm1562_vm0, %v1561_v1 }
 0x418   : > { %v1031_v6 = vpack.c.bf16 %v928_v5, %v928_v5 }
 0x419   : > { %v1472_v9 = vpop.f32.mrf.mxu0  ;;  %v1477_v10 = vpop.f32.mrf.mxu1 }
 0x41a   : > { %1500 = vmatmul.mubr.msk.bf16.vlgmr.msra.gmra.mxu1 %vm580_vm2, %v1031_v6 }
 0x41b   : > { %v931_v11 = vpop.f32.mrf.mxu1  ;;  %v976_v12 = vpop.f32.mrf.mxu0  ;;  %1510 = vmatpush3.bf16.msra.mxu1 %v1180_v8  ;;  %1511 = vmatprep.mubr.msk.bf16.mxu1 %vm1562_vm0, %v1561_v1 }
 0x41c   : > { %v1032_v13 = vpack.c.bf16 %v976_v12, %v976_v12 }
 0x41d   : > { %v1478_v14 = vpop.f32.mrf.mxu1  ;;  %v1483_v15 = vpop.f32.mrf.mxu0 }
 0x41e   : > { %1506 = vmatmul.mubr.msk.bf16.vlgmr.msra.gmra.mxu0 %vm580_vm2, %v1032_v13 }
 0x41f   : > { %v979_v16 = vpop.f32.mrf.mxu0  ;;  %v1024_v18 = vpop.f32.mrf.mxu1 }
 0x420   : > { %v1033_v19 = vpack.c.bf16 %v1024_v18, %v1024_v18 }
 0x421   : > { %v1484_v21 = vpop.f32.mrf.mxu0  ;;  %v1489_v22 = vpop.f32.mrf.mxu1 }
 0x422   : > { %1512 = vmatmul.mubr.msk.bf16.vlgmr.msra.gmra.mxu1 %vm580_vm2, %v1033_v19 }
 0x423   : > { %v1027_v23 = vpop.f32.mrf.mxu1 }
 0x425   : > { %v1490_v24 = vpop.f32.mrf.mxu1 }
 0x4d6   : > { %v1078_v25 = vpop.f32.mrf.mxu0 }
 0x4d7   : > { %v1222_v33 = vsel %vm373_vm1, %v1078_v25, 0.0 }
 0x4d8   : > { %v1495_v26 = vpop.f32.mrf.mxu0 }
 0x4da   : > { %v1081_v17 = vpop.f32.mrf.mxu0  ;;  %v1124_v27 = vpop.f32.mrf.mxu1 }
 0x4db   : > { %v1223_v29 = vsel %vm373_vm1, %v1124_v27, 0.0 }
 0x4dc   : > { %v1496_v28 = vpop.f32.mrf.mxu0  ;;  %v1501_v1 = vpop.f32.mrf.mxu1  ;;  %v1224_v36 = vadd.f32 %v1223_v29, %v1222_v33 }
 0x4de   : > { %v1127_v30 = vpop.f32.mrf.mxu1  ;;  %v1170_v32 = vpop.f32.mrf.mxu0 }
 0x4df   : > { %v1225_v35 = vsel %vm373_vm1, %v1170_v32, 0.0 }
 0x4e0   : > { %v1502_v37 = vpop.f32.mrf.mxu1  ;;  %v1507_v38 = vpop.f32.mrf.mxu0  ;;  %v1226_v39 = vadd.f32 %v1225_v35, %v1224_v36 }
 0x4e2   : > { %v1173_v40 = vpop.f32.mrf.mxu0  ;;  %v1216_v41 = vpop.f32.mrf.mxu1 }
 0x4e3   : > { %v1227_v42 = vsel %vm373_vm1, %v1216_v41, 0.0 }
 0x4e4   : > { %v1228_v44 = vadd.f32 %v1227_v42, %v1226_v39  ;;  %v1508_v45 = vpop.f32.mrf.mxu0  ;;  %v1513_v31 = vpop.f32.mrf.mxu1 }
 0x4e6   : > { %v1236_v47 = vadd.f32 %v1370_v43, %v1228_v44  ;;  %v1219_v34 = vpop.f32.mrf.mxu1 }
 0x4e8   : > { %v1514_v20 = vpop.f32.mrf.mxu1  ;;  %v1238_v48 = vadd.f32 %v1237_v46, %v1236_v47 }
 0x4ea   : > { %v1239_v49 = vsel %vm373_vm1, %v1238_v48, 0.0 }
 0x4eb   : > { %1240 = vadd.xlane.f32.xlu0 %v1239_v49 }
 0x574   : > { %v1241_v50 = vpop.xlane.xlu0 %1240 }
 0x575   : > { %v1243_v51 = vmul.f32 0.03125, %v1241_v50 }
 0x577   : > { %v1244_v52 = vsub.f32 %v1238_v48, %v1243_v51 }
 0x579   : > { %v1245_v53 = vmul.f32 %v1244_v52, %v1244_v52 }
 0x57b   : > { %v1246_v54 = vsel %vm373_vm1, %v1245_v53, 0.0 }
 0x57c   : > { %1247 = vadd.xlane.f32.xlu1 %v1246_v54 }
 0x605   : > { %v1248_v55 = vpop.xlane.xlu1 %1247 }
 0x606   : > { %v1249_v56 = vmul.f32 0.03125, %v1248_v55 }
 0x608   : > { %v1250_v57 = vadd.f32 1e-12, %v1249_v56 }
 0x60a   : > { %1551 = vrsqrt.f32 %v1250_v57 }
 0x617   : > { %v1552_v7 = vpop.eup %1551 }
 0x618   : > { %v1252_v59 = vmul.f32 %v1552_v7, %v1244_v52 }
 0x61a   : > { %v1260_v61 = vmul.f32 %v1371_v58, %v1252_v59 }
 0x61c   : > { %v1268_v62 = vadd.f32 %v1372_v60, %v1260_v61 }
 0x61e   : > { %v1269_v63 = vpack.c.bf16 %v1268_v62, %v1268_v62 }
 0x620   : > { %1271 = vst.msk [vmem:[%s314_s18] sm:$0xf] %vm1270_vm4, %v1269_v63 }
 0x621 PF: > { %s18_s27 = sadd.s32 1, %s1559_s27  }
 0x622   : > { %p15_p4 = scmp.ge.s32.totalorder %s18_s27, 4  }
 0x624   :  { %17 = sbr.rel (!%p15_p4) target bundleno = 1 (0x1), region = 85 }

</bundles_post_ra>
